<compile_context>
chip_gen: v7x
topology: tpu7x:2x2x1
jax: 0.10.0
libtpu: 0.0.40
codegen_flags: <defaults>
</compile_context>

<pallas_src>
import functools

import jax
import jax.numpy as jnp
from jax.experimental import pallas as pl
from jax.experimental.pallas import tpu as pltpu


def _spiking_decay_kernel(xi_ref, v_init_ref, s_init_ref,
                          s_seq_ref, v_state_ref,
                          s_carry_ref,
                          *, a, v_th, tc):
    """One (row_tile, time_chunk) grid point of the fused SpikingDecay recurrence."""
    tb = pl.program_id(1)

    # First time-chunk of each row tile: load the initial state.  v lives in the
    # resident aliased output block, s in a VMEM scratch (no HBM traffic for s).
    @pl.when(tb == 0)
    def _():
        v_state_ref[...] = v_init_ref[...]
        s_carry_ref[...] = s_init_ref[...]

    v = v_state_ref[...]
    s = s_carry_ref[...]

    # Unrolled static loop over the Tc timesteps packed into this grid step.
    for lt in range(tc):
        # The module's forward() returns the spike state *before* this step's update.
        s_seq_ref[lt] = s.astype(s_seq_ref.dtype)

        # Membrane update: leaky decay (a = 1/tau) with soft reset by the previous spike.
        v = (1.0 - s) * a * v + xi_ref[lt].astype(v.dtype)

        # Heaviside H(x) = 0.5*(sign(x)+1) as compare+select on the VPU
        # (matches torch.sign semantics incl. x == 0 -> 0.5).
        d = v - v_th
        s = jnp.where(d > 0.0, 1.0, jnp.where(d < 0.0, 0.0, 0.5))

    v_state_ref[...] = v
    s_carry_ref[...] = s


def _pick_layout(total, sublane):
    """Lane-dense (rows, lane) 2-D layout for the flattened state; pads ragged sizes."""
    for lane in (1024, 512, 256, 128):
        if total % lane == 0 and (total // lane) % sublane == 0:
            return total // lane, lane, total
    if sublane > 8:
        for lane in (1024, 512, 256, 128):
            if total % lane == 0 and (total // lane) % 8 == 0:
                return total // lane, lane, total
    for lane in (1024, 512, 256, 128):
        # small exact fits: rows < 8 is legal as a full-extent block
        if total % lane == 0 and total // lane <= 8:
            return total // lane, lane, total
    # ragged size: pad up to a multiple of (sublane x 128) lanes
    lane = 128
    rows = -(-total // lane)
    rows = -(-rows // sublane) * sublane
    return rows, lane, rows * lane


def _pick_tile_rows(rows, lane, sublane=8, state_bytes_cap=2 << 20):
    """Row tile: multiple of `sublane` dividing rows, capped by a per-block byte budget."""
    if rows % sublane != 0:
        if rows % 8 == 0:
            sublane = 8
        else:
            return rows  # rows < 8: full-extent block is always legal
    max_rows = max(sublane, (state_bytes_cap // (lane * 4)) // sublane * sublane)
    tile = min(rows, max_rows)
    # Keep >= 2 row tiles when possible so the "parallel" axis feeds both v7x TensorCores.
    if tile == rows and rows >= 2 * sublane:
        tile = rows // 2 // sublane * sublane
    while rows % tile != 0:
        tile -= sublane
    return tile


def _pick_time_chunk(T, per_step_bytes, target_bytes):
    """Largest divisor of T whose xi chunk stays under the per-grid-step byte target."""
    cap = max(1, int(target_bytes // max(per_step_bytes, 1)))
    best = 1
    for cand in range(1, min(T, cap) + 1):
        if T % cand == 0:
            best = cand
    return best


def _vmem_capacity_bytes():
    try:
        return int(pltpu.get_tpu_info().vmem_capacity_bytes)
    except Exception:
        return 64 * 1024 * 1024  # conservative default (v7x per-TC VMEM)


def spiking_decay_forward(xs, v, s, *, tau, v_th=1.0, spike_dtype=None):
    """Run T fused SpikingDecay steps.

    xs:   (T, *state_shape) inputs, one slice per timestep.
    v, s: (*state_shape) membrane potential / spike state (zeros for init=True).
    spike_dtype: dtype of the returned spike train (bfloat16 is exact for {0,0.5,1}).

    Returns (s_seq, v_new, s_new): s_seq[t] is what the PyTorch forward() returns at
    step t (the spike state *before* that step's update); (v_new, s_new) is the final
    carried state (self.v, self.s).
    """
    a = 1.0 / tau
    v_th = float(v_th)
    T = xs.shape[0]
    state_shape = v.shape
    total = v.size
    if spike_dtype is None:
        spike_dtype = xs.dtype

    xs_item = jnp.dtype(xs.dtype).itemsize
    sp_item = jnp.dtype(spike_dtype).itemsize
    sublane = 16 if min(xs_item, sp_item) < 4 else 8

    rows, lane, padded = _pick_layout(total, sublane)
    tile_r = _pick_tile_rows(rows, lane, sublane)

    # Per-grid-step byte target: larger on v5e/v6e (128 MiB VMEM), smaller on v7x (64 MiB).
    vmem_cap = _vmem_capacity_bytes()
    chunk_target = (8 << 20) if vmem_cap >= (96 << 20) else (4 << 20)
    tc = _pick_time_chunk(T, tile_r * lane * xs_item, chunk_target)

    # Derived VMEM budget: double-buffered xi + s_seq chunks, v/s init inputs (2 bufs
    # each), resident v output (2 bufs) and the s scratch (1 buf), plus headroom.
    seq_block_bytes = tc * tile_r * lane * (xs_item + sp_item)
    state_block_bytes = tile_r * lane * 4
    footprint = 2 * seq_block_bytes + 7 * state_block_bytes
    vmem_limit = int(min(max(2 * footprint, 32 << 20), vmem_cap - (8 << 20)))

    def _pad(flat):
        pad = padded - flat.shape[-1]
        if pad == 0:
            return flat
        cfg = [(0, 0)] * (flat.ndim - 1) + [(0, pad)]
        return jnp.pad(flat, cfg)

    xs2 = _pad(xs.reshape(T, total)).reshape(T, rows, lane)
    v2 = _pad(v.reshape(total).astype(jnp.float32)).reshape(rows, lane)
    s2 = _pad(s.reshape(total).astype(jnp.float32)).reshape(rows, lane)

    grid = (rows // tile_r, T // tc)
    seq_blk = pl.BlockSpec((tc, tile_r, lane), lambda i, t: (t, i, 0))
    state_blk = pl.BlockSpec((tile_r, lane), lambda i, t: (i, 0))
    # NOTE: the init-state inputs are only read at t==0; single-buffering them
    # (pipeline_mode=pl.Buffered(1)) would free 2 more buffers, left at the default
    # double-buffering for portability.

    kernel = functools.partial(_spiking_decay_kernel, a=a, v_th=v_th, tc=tc)

    s_seq2, v_new2 = pl.pallas_call(
        kernel,
        out_shape=(
            jax.ShapeDtypeStruct((T, rows, lane), spike_dtype),
            jax.ShapeDtypeStruct((rows, lane), jnp.float32),
        ),
        grid_spec=pltpu.PrefetchScalarGridSpec(
            num_scalar_prefetch=0,
            grid=grid,
            in_specs=[seq_blk, state_blk, state_blk],
            out_specs=[seq_blk, state_blk],
            scratch_shapes=[pltpu.VMEM((tile_r, lane), jnp.float32)],
        ),
        # In-place membrane-state update: v -> v_new.
        input_output_aliases={1: 1},
        compiler_params=pltpu.CompilerParams(
            dimension_semantics=("parallel", "arbitrary"),
            vmem_limit_bytes=vmem_limit,
        ),
    )(xs2, v2, s2)

    s_seq = s_seq2.reshape(T, padded)[:, :total].reshape((T,) + state_shape)
    v_fin = v_new2.reshape(padded)[:total].reshape(state_shape)
    # self.s is always H(self.v - v0) after a forward step; derive it from v_fin.
    s_fin = (0.5 * (jnp.sign(v_fin - v_th) + 1.0)).astype(v_fin.dtype)
    return s_seq, v_fin, s_fin


# Donate v so the aliased state update is truly in-place (no defensive HBM copy).
spiking_decay_forward_jit = jax.jit(
    spiking_decay_forward,
    static_argnames=("tau", "v_th", "spike_dtype"),
    donate_argnums=(1,),
)


def spiking_decay_reference(xs, v, s, *, tau, v_th=1.0):
    """Pure-jnp reference matching the PyTorch module, unrolled over T."""
    a = 1.0 / tau
    outs = []
    for t in range(xs.shape[0]):
        outs.append(s)
        v = (1.0 - s) * a * v + xs[t]
        s = 0.5 * (jnp.sign(v - v_th) + 1.0)
    return jnp.stack(outs), v, s


if __name__ == "__main__":
    key = jax.random.PRNGKey(0)
    N, C, H, W = 2, 4, 16, 16          # NCHW, conv-style spiking input
    T = 8                              # timesteps, all fused into one kernel
    tau, v_th, beta = 2.0, 1.0, 5.0    # beta only affects the surrogate backward

    xs = jax.random.uniform(key, (T, N, C, H, W), dtype=jnp.float32)

    # init=True -> zero state
    v_init = jnp.zeros((N, C, H, W), jnp.float32)
    s_init = jnp.zeros((N, C, H, W), jnp.float32)

    # Reference first (v_init is donated to the kernel call below).
    s_seq_ref, v_ref, s_ref = spiking_decay_reference(
        xs, v_init, s_init, tau=tau, v_th=v_th)

    s_seq, v_fin, s_fin = spiking_decay_forward_jit(
        xs, v_init, s_init, tau=tau, v_th=v_th, spike_dtype=jnp.bfloat16)
    s_seq = jax.block_until_ready(s_seq)
    v_fin = jax.block_until_ready(v_fin)
    s_fin = jax.block_until_ready(s_fin)

    # Spike values {0, 0.5, 1} are exactly representable in bfloat16.
    assert jnp.allclose(s_seq.astype(jnp.float32), s_seq_ref, atol=1e-6), "spike-train mismatch"
    assert jnp.allclose(s_fin, s_ref, atol=1e-6), "final spike mismatch"
    assert jnp.allclose(v_fin, v_ref, atol=1e-5), "membrane mismatch"
    print("KERNEL_OK")
</pallas_src>

<mosaic_0001>
module attributes {stable_mosaic.version = 11 : i64} {
  func.func @_spiking_decay_kernel(%arg0: i32, %arg1: i32, %arg2: memref<8x16x128xf32, #tpu.memory_space<vmem>>, %arg3: memref<16x128xf32, #tpu.memory_space<vmem>>, %arg4: memref<16x128xf32, #tpu.memory_space<vmem>>, %arg5: memref<8x16x128xbf16, #tpu.memory_space<vmem>>, %arg6: memref<16x128xf32, #tpu.memory_space<vmem>>, %arg7: memref<16x128xf32, #tpu.memory_space<vmem>>) attributes {dimension_semantics = [#tpu.dimension_semantics<parallel>, #tpu.dimension_semantics<arbitrary>], iteration_bounds = array<i64: 1, 1>, scalar_prefetch = 0 : i64, scratch_operands = 1 : i64, tpu.core_type = #tpu.core_type<tc>, window_params = [{transform_indices = @transform_0, window_bounds = array<i64: 8, 16, 128>}, {transform_indices = @transform_1, window_bounds = array<i64: 16, 128>}, {transform_indices = @transform_2, window_bounds = array<i64: 16, 128>}, {transform_indices = @transform_3, window_bounds = array<i64: 8, 16, 128>}, {transform_indices = @transform_4, window_bounds = array<i64: 16, 128>}]} {
    %c0_i32 = arith.constant 0 : i32
    %0 = arith.cmpi eq, %arg1, %c0_i32 : i32
    %1 = arith.extui %0 : i1 to i32
    %c0_i32_0 = arith.constant 0 : i32
    %2 = arith.cmpi ne, %1, %c0_i32_0 : i32
    scf.if %2 {
      %c0_112 = arith.constant 0 : index
      %c0_113 = arith.constant 0 : index
      %191 = vector.load %arg3[%c0_112, %c0_113] : memref<16x128xf32, #tpu.memory_space<vmem>>, vector<16x128xf32>
      %c0_114 = arith.constant 0 : index
      %c0_115 = arith.constant 0 : index
      %192 = vector.load %arg6[%c0_114, %c0_115] : memref<16x128xf32, #tpu.memory_space<vmem>>, vector<16x128xf32>
      tpu.vector_store %arg6[%c0_114, %c0_115], %191 {strides = array<i32>} : memref<16x128xf32, #tpu.memory_space<vmem>>, vector<16x128xf32>,
      %c0_116 = arith.constant 0 : index
      %c0_117 = arith.constant 0 : index
      %193 = vector.load %arg4[%c0_116, %c0_117] : memref<16x128xf32, #tpu.memory_space<vmem>>, vector<16x128xf32>
      %c0_118 = arith.constant 0 : index
      %c0_119 = arith.constant 0 : index
      %194 = vector.load %arg7[%c0_118, %c0_119] : memref<16x128xf32, #tpu.memory_space<vmem>>, vector<16x128xf32>
      tpu.vector_store %arg7[%c0_118, %c0_119], %193 {strides = array<i32>} : memref<16x128xf32, #tpu.memory_space<vmem>>, vector<16x128xf32>,
    } else {
    }
    %c0 = arith.constant 0 : index
    %c0_1 = arith.constant 0 : index
    %3 = vector.load %arg6[%c0, %c0_1] : memref<16x128xf32, #tpu.memory_space<vmem>>, vector<16x128xf32>
    %c0_2 = arith.constant 0 : index
    %c0_3 = arith.constant 0 : index
    %4 = vector.load %arg7[%c0_2, %c0_3] : memref<16x128xf32, #tpu.memory_space<vmem>>, vector<16x128xf32>
    %5 = arith.truncf %4 : vector<16x128xf32> to vector<16x128xbf16>
    %c0_4 = arith.constant 0 : index
    %c0_5 = arith.constant 0 : index
    %c0_6 = arith.constant 0 : index
    %6 = vector.load %arg5[%c0_4, %c0_5, %c0_6] : memref<8x16x128xbf16, #tpu.memory_space<vmem>>, vector<1x16x128xbf16>
    %7 = vector.shape_cast %6 : vector<1x16x128xbf16> to vector<16x128xbf16>
    %8 = vector.shape_cast %5 : vector<16x128xbf16> to vector<1x16x128xbf16>
    tpu.vector_store %arg5[%c0_4, %c0_5, %c0_6], %8 {strides = array<i32>} : memref<8x16x128xbf16, #tpu.memory_space<vmem>>, vector<1x16x128xbf16>,
    %cst = arith.constant 1.000000e+00 : f32
    %9 = vector.broadcast %cst : f32 to vector<16x128xf32>
    %10 = arith.subf %9, %4 : vector<16x128xf32>
    %cst_7 = arith.constant 5.000000e-01 : f32
    %11 = vector.broadcast %cst_7 : f32 to vector<16x128xf32>
    %12 = arith.mulf %10, %11 : vector<16x128xf32>
    %13 = arith.mulf %12, %3 : vector<16x128xf32>
    %c0_8 = arith.constant 0 : index
    %c0_9 = arith.constant 0 : index
    %c0_10 = arith.constant 0 : index
    %14 = vector.load %arg2[%c0_8, %c0_9, %c0_10] : memref<8x16x128xf32, #tpu.memory_space<vmem>>, vector<1x16x128xf32>
    %15 = vector.shape_cast %14 : vector<1x16x128xf32> to vector<16x128xf32>
    %16 = arith.addf %13, %15 : vector<16x128xf32>
    %cst_11 = arith.constant 1.000000e+00 : f32
    %17 = vector.broadcast %cst_11 : f32 to vector<16x128xf32>
    %18 = arith.subf %16, %17 : vector<16x128xf32>
    %cst_12 = arith.constant 0.000000e+00 : f32
    %19 = vector.broadcast %cst_12 : f32 to vector<16x128xf32>
    %20 = arith.cmpf ogt, %18, %19 : vector<16x128xf32>
    %cst_13 = arith.constant 0.000000e+00 : f32
    %21 = vector.broadcast %cst_13 : f32 to vector<16x128xf32>
    %22 = arith.cmpf olt, %18, %21 : vector<16x128xf32>
    %cst_14 = arith.constant 0.000000e+00 : f32
    %cst_15 = arith.constant 5.000000e-01 : f32
    %23 = vector.broadcast %cst_14 : f32 to vector<16x128xf32>
    %24 = vector.broadcast %cst_15 : f32 to vector<16x128xf32>
    %25 = arith.select %22, %23, %24 : vector<16x128xi1>, vector<16x128xf32>
    %cst_16 = arith.constant 1.000000e+00 : f32
    %26 = vector.broadcast %cst_16 : f32 to vector<16x128xf32>
    %27 = arith.select %20, %26, %25 : vector<16x128xi1>, vector<16x128xf32>
    %28 = arith.truncf %27 : vector<16x128xf32> to vector<16x128xbf16>
    %c1 = arith.constant 1 : index
    %c0_17 = arith.constant 0 : index
    %c0_18 = arith.constant 0 : index
    %29 = vector.load %arg5[%c1, %c0_17, %c0_18] : memref<8x16x128xbf16, #tpu.memory_space<vmem>>, vector<1x16x128xbf16>
    %30 = vector.shape_cast %29 : vector<1x16x128xbf16> to vector<16x128xbf16>
    %31 = vector.shape_cast %28 : vector<16x128xbf16> to vector<1x16x128xbf16>
    tpu.vector_store %arg5[%c1, %c0_17, %c0_18], %31 {strides = array<i32>} : memref<8x16x128xbf16, #tpu.memory_space<vmem>>, vector<1x16x128xbf16>,
    %cst_19 = arith.constant 1.000000e+00 : f32
    %32 = vector.broadcast %cst_19 : f32 to vector<16x128xf32>
    %33 = arith.subf %32, %27 : vector<16x128xf32>
    %cst_20 = arith.constant 5.000000e-01 : f32
    %34 = vector.broadcast %cst_20 : f32 to vector<16x128xf32>
    %35 = arith.mulf %33, %34 : vector<16x128xf32>
    %36 = arith.mulf %35, %16 : vector<16x128xf32>
    %c1_21 = arith.constant 1 : index
    %c0_22 = arith.constant 0 : index
    %c0_23 = arith.constant 0 : index
    %37 = vector.load %arg2[%c1_21, %c0_22, %c0_23] : memref<8x16x128xf32, #tpu.memory_space<vmem>>, vector<1x16x128xf32>
    %38 = vector.shape_cast %37 : vector<1x16x128xf32> to vector<16x128xf32>
    %39 = arith.addf %36, %38 : vector<16x128xf32>
    %cst_24 = arith.constant 1.000000e+00 : f32
    %40 = vector.broadcast %cst_24 : f32 to vector<16x128xf32>
    %41 = arith.subf %39, %40 : vector<16x128xf32>
    %cst_25 = arith.constant 0.000000e+00 : f32
    %42 = vector.broadcast %cst_25 : f32 to vector<16x128xf32>
    %43 = arith.cmpf ogt, %41, %42 : vector<16x128xf32>
    %cst_26 = arith.constant 0.000000e+00 : f32
    %44 = vector.broadcast %cst_26 : f32 to vector<16x128xf32>
    %45 = arith.cmpf olt, %41, %44 : vector<16x128xf32>
    %cst_27 = arith.constant 0.000000e+00 : f32
    %cst_28 = arith.constant 5.000000e-01 : f32
    %46 = vector.broadcast %cst_27 : f32 to vector<16x128xf32>
    %47 = vector.broadcast %cst_28 : f32 to vector<16x128xf32>
    %48 = arith.select %45, %46, %47 : vector<16x128xi1>, vector<16x128xf32>
    %cst_29 = arith.constant 1.000000e+00 : f32
    %49 = vector.broadcast %cst_29 : f32 to vector<16x128xf32>
    %50 = arith.select %43, %49, %48 : vector<16x128xi1>, vector<16x128xf32>
    %51 = arith.truncf %50 : vector<16x128xf32> to vector<16x128xbf16>
    %c2 = arith.constant 2 : index
    %c0_30 = arith.constant 0 : index
    %c0_31 = arith.constant 0 : index
    %52 = vector.load %arg5[%c2, %c0_30, %c0_31] : memref<8x16x128xbf16, #tpu.memory_space<vmem>>, vector<1x16x128xbf16>
    %53 = vector.shape_cast %52 : vector<1x16x128xbf16> to vector<16x128xbf16>
    %54 = vector.shape_cast %51 : vector<16x128xbf16> to vector<1x16x128xbf16>
    tpu.vector_store %arg5[%c2, %c0_30, %c0_31], %54 {strides = array<i32>} : memref<8x16x128xbf16, #tpu.memory_space<vmem>>, vector<1x16x128xbf16>,
    %cst_32 = arith.constant 1.000000e+00 : f32
    %55 = vector.broadcast %cst_32 : f32 to vector<16x128xf32>
    %56 = arith.subf %55, %50 : vector<16x128xf32>
    %cst_33 = arith.constant 5.000000e-01 : f32
    %57 = vector.broadcast %cst_33 : f32 to vector<16x128xf32>
    %58 = arith.mulf %56, %57 : vector<16x128xf32>
    %59 = arith.mulf %58, %39 : vector<16x128xf32>
    %c2_34 = arith.constant 2 : index
    %c0_35 = arith.constant 0 : index
    %c0_36 = arith.constant 0 : index
    %60 = vector.load %arg2[%c2_34, %c0_35, %c0_36] : memref<8x16x128xf32, #tpu.memory_space<vmem>>, vector<1x16x128xf32>
    %61 = vector.shape_cast %60 : vector<1x16x128xf32> to vector<16x128xf32>
    %62 = arith.addf %59, %61 : vector<16x128xf32>
    %cst_37 = arith.constant 1.000000e+00 : f32
    %63 = vector.broadcast %cst_37 : f32 to vector<16x128xf32>
    %64 = arith.subf %62, %63 : vector<16x128xf32>
    %cst_38 = arith.constant 0.000000e+00 : f32
    %65 = vector.broadcast %cst_38 : f32 to vector<16x128xf32>
    %66 = arith.cmpf ogt, %64, %65 : vector<16x128xf32>
    %cst_39 = arith.constant 0.000000e+00 : f32
    %67 = vector.broadcast %cst_39 : f32 to vector<16x128xf32>
    %68 = arith.cmpf olt, %64, %67 : vector<16x128xf32>
    %cst_40 = arith.constant 0.000000e+00 : f32
    %cst_41 = arith.constant 5.000000e-01 : f32
    %69 = vector.broadcast %cst_40 : f32 to vector<16x128xf32>
    %70 = vector.broadcast %cst_41 : f32 to vector<16x128xf32>
    %71 = arith.select %68, %69, %70 : vector<16x128xi1>, vector<16x128xf32>
    %cst_42 = arith.constant 1.000000e+00 : f32
    %72 = vector.broadcast %cst_42 : f32 to vector<16x128xf32>
    %73 = arith.select %66, %72, %71 : vector<16x128xi1>, vector<16x128xf32>
    %74 = arith.truncf %73 : vector<16x128xf32> to vector<16x128xbf16>
    %c3 = arith.constant 3 : index
    %c0_43 = arith.constant 0 : index
    %c0_44 = arith.constant 0 : index
    %75 = vector.load %arg5[%c3, %c0_43, %c0_44] : memref<8x16x128xbf16, #tpu.memory_space<vmem>>, vector<1x16x128xbf16>
    %76 = vector.shape_cast %75 : vector<1x16x128xbf16> to vector<16x128xbf16>
    %77 = vector.shape_cast %74 : vector<16x128xbf16> to vector<1x16x128xbf16>
    tpu.vector_store %arg5[%c3, %c0_43, %c0_44], %77 {strides = array<i32>} : memref<8x16x128xbf16, #tpu.memory_space<vmem>>, vector<1x16x128xbf16>,
    %cst_45 = arith.constant 1.000000e+00 : f32
    %78 = vector.broadcast %cst_45 : f32 to vector<16x128xf32>
    %79 = arith.subf %78, %73 : vector<16x128xf32>
    %cst_46 = arith.constant 5.000000e-01 : f32
    %80 = vector.broadcast %cst_46 : f32 to vector<16x128xf32>
    %81 = arith.mulf %79, %80 : vector<16x128xf32>
    %82 = arith.mulf %81, %62 : vector<16x128xf32>
    %c3_47 = arith.constant 3 : index
    %c0_48 = arith.constant 0 : index
    %c0_49 = arith.constant 0 : index
    %83 = vector.load %arg2[%c3_47, %c0_48, %c0_49] : memref<8x16x128xf32, #tpu.memory_space<vmem>>, vector<1x16x128xf32>
    %84 = vector.shape_cast %83 : vector<1x16x128xf32> to vector<16x128xf32>
    %85 = arith.addf %82, %84 : vector<16x128xf32>
    %cst_50 = arith.constant 1.000000e+00 : f32
    %86 = vector.broadcast %cst_50 : f32 to vector<16x128xf32>
    %87 = arith.subf %85, %86 : vector<16x128xf32>
    %cst_51 = arith.constant 0.000000e+00 : f32
    %88 = vector.broadcast %cst_51 : f32 to vector<16x128xf32>
    %89 = arith.cmpf ogt, %87, %88 : vector<16x128xf32>
    %cst_52 = arith.constant 0.000000e+00 : f32
    %90 = vector.broadcast %cst_52 : f32 to vector<16x128xf32>
    %91 = arith.cmpf olt, %87, %90 : vector<16x128xf32>
    %cst_53 = arith.constant 0.000000e+00 : f32
    %cst_54 = arith.constant 5.000000e-01 : f32
    %92 = vector.broadcast %cst_53 : f32 to vector<16x128xf32>
    %93 = vector.broadcast %cst_54 : f32 to vector<16x128xf32>
    %94 = arith.select %91, %92, %93 : vector<16x128xi1>, vector<16x128xf32>
    %cst_55 = arith.constant 1.000000e+00 : f32
    %95 = vector.broadcast %cst_55 : f32 to vector<16x128xf32>
    %96 = arith.select %89, %95, %94 : vector<16x128xi1>, vector<16x128xf32>
    %97 = arith.truncf %96 : vector<16x128xf32> to vector<16x128xbf16>
    %c4 = arith.constant 4 : index
    %c0_56 = arith.constant 0 : index
    %c0_57 = arith.constant 0 : index
    %98 = vector.load %arg5[%c4, %c0_56, %c0_57] : memref<8x16x128xbf16, #tpu.memory_space<vmem>>, vector<1x16x128xbf16>
    %99 = vector.shape_cast %98 : vector<1x16x128xbf16> to vector<16x128xbf16>
    %100 = vector.shape_cast %97 : vector<16x128xbf16> to vector<1x16x128xbf16>
    tpu.vector_store %arg5[%c4, %c0_56, %c0_57], %100 {strides = array<i32>} : memref<8x16x128xbf16, #tpu.memory_space<vmem>>, vector<1x16x128xbf16>,
    %cst_58 = arith.constant 1.000000e+00 : f32
    %101 = vector.broadcast %cst_58 : f32 to vector<16x128xf32>
    %102 = arith.subf %101, %96 : vector<16x128xf32>
    %cst_59 = arith.constant 5.000000e-01 : f32
    %103 = vector.broadcast %cst_59 : f32 to vector<16x128xf32>
    %104 = arith.mulf %102, %103 : vector<16x128xf32>
    %105 = arith.mulf %104, %85 : vector<16x128xf32>
    %c4_60 = arith.constant 4 : index
    %c0_61 = arith.constant 0 : index
    %c0_62 = arith.constant 0 : index
    %106 = vector.load %arg2[%c4_60, %c0_61, %c0_62] : memref<8x16x128xf32, #tpu.memory_space<vmem>>, vector<1x16x128xf32>
    %107 = vector.shape_cast %106 : vector<1x16x128xf32> to vector<16x128xf32>
    %108 = arith.addf %105, %107 : vector<16x128xf32>
    %cst_63 = arith.constant 1.000000e+00 : f32
    %109 = vector.broadcast %cst_63 : f32 to vector<16x128xf32>
    %110 = arith.subf %108, %109 : vector<16x128xf32>
    %cst_64 = arith.constant 0.000000e+00 : f32
    %111 = vector.broadcast %cst_64 : f32 to vector<16x128xf32>
    %112 = arith.cmpf ogt, %110, %111 : vector<16x128xf32>
    %cst_65 = arith.constant 0.000000e+00 : f32
    %113 = vector.broadcast %cst_65 : f32 to vector<16x128xf32>
    %114 = arith.cmpf olt, %110, %113 : vector<16x128xf32>
    %cst_66 = arith.constant 0.000000e+00 : f32
    %cst_67 = arith.constant 5.000000e-01 : f32
    %115 = vector.broadcast %cst_66 : f32 to vector<16x128xf32>
    %116 = vector.broadcast %cst_67 : f32 to vector<16x128xf32>
    %117 = arith.select %114, %115, %116 : vector<16x128xi1>, vector<16x128xf32>
    %cst_68 = arith.constant 1.000000e+00 : f32
    %118 = vector.broadcast %cst_68 : f32 to vector<16x128xf32>
    %119 = arith.select %112, %118, %117 : vector<16x128xi1>, vector<16x128xf32>
    %120 = arith.truncf %119 : vector<16x128xf32> to vector<16x128xbf16>
    %c5 = arith.constant 5 : index
    %c0_69 = arith.constant 0 : index
    %c0_70 = arith.constant 0 : index
    %121 = vector.load %arg5[%c5, %c0_69, %c0_70] : memref<8x16x128xbf16, #tpu.memory_space<vmem>>, vector<1x16x128xbf16>
    %122 = vector.shape_cast %121 : vector<1x16x128xbf16> to vector<16x128xbf16>
    %123 = vector.shape_cast %120 : vector<16x128xbf16> to vector<1x16x128xbf16>
    tpu.vector_store %arg5[%c5, %c0_69, %c0_70], %123 {strides = array<i32>} : memref<8x16x128xbf16, #tpu.memory_space<vmem>>, vector<1x16x128xbf16>,
    %cst_71 = arith.constant 1.000000e+00 : f32
    %124 = vector.broadcast %cst_71 : f32 to vector<16x128xf32>
    %125 = arith.subf %124, %119 : vector<16x128xf32>
    %cst_72 = arith.constant 5.000000e-01 : f32
    %126 = vector.broadcast %cst_72 : f32 to vector<16x128xf32>
    %127 = arith.mulf %125, %126 : vector<16x128xf32>
    %128 = arith.mulf %127, %108 : vector<16x128xf32>
    %c5_73 = arith.constant 5 : index
    %c0_74 = arith.constant 0 : index
    %c0_75 = arith.constant 0 : index
    %129 = vector.load %arg2[%c5_73, %c0_74, %c0_75] : memref<8x16x128xf32, #tpu.memory_space<vmem>>, vector<1x16x128xf32>
    %130 = vector.shape_cast %129 : vector<1x16x128xf32> to vector<16x128xf32>
    %131 = arith.addf %128, %130 : vector<16x128xf32>
    %cst_76 = arith.constant 1.000000e+00 : f32
    %132 = vector.broadcast %cst_76 : f32 to vector<16x128xf32>
    %133 = arith.subf %131, %132 : vector<16x128xf32>
    %cst_77 = arith.constant 0.000000e+00 : f32
    %134 = vector.broadcast %cst_77 : f32 to vector<16x128xf32>
    %135 = arith.cmpf ogt, %133, %134 : vector<16x128xf32>
    %cst_78 = arith.constant 0.000000e+00 : f32
    %136 = vector.broadcast %cst_78 : f32 to vector<16x128xf32>
    %137 = arith.cmpf olt, %133, %136 : vector<16x128xf32>
    %cst_79 = arith.constant 0.000000e+00 : f32
    %cst_80 = arith.constant 5.000000e-01 : f32
    %138 = vector.broadcast %cst_79 : f32 to vector<16x128xf32>
    %139 = vector.broadcast %cst_80 : f32 to vector<16x128xf32>
    %140 = arith.select %137, %138, %139 : vector<16x128xi1>, vector<16x128xf32>
    %cst_81 = arith.constant 1.000000e+00 : f32
    %141 = vector.broadcast %cst_81 : f32 to vector<16x128xf32>
    %142 = arith.select %135, %141, %140 : vector<16x128xi1>, vector<16x128xf32>
    %143 = arith.truncf %142 : vector<16x128xf32> to vector<16x128xbf16>
    %c6 = arith.constant 6 : index
    %c0_82 = arith.constant 0 : index
    %c0_83 = arith.constant 0 : index
    %144 = vector.load %arg5[%c6, %c0_82, %c0_83] : memref<8x16x128xbf16, #tpu.memory_space<vmem>>, vector<1x16x128xbf16>
    %145 = vector.shape_cast %144 : vector<1x16x128xbf16> to vector<16x128xbf16>
    %146 = vector.shape_cast %143 : vector<16x128xbf16> to vector<1x16x128xbf16>
    tpu.vector_store %arg5[%c6, %c0_82, %c0_83], %146 {strides = array<i32>} : memref<8x16x128xbf16, #tpu.memory_space<vmem>>, vector<1x16x128xbf16>,
    %cst_84 = arith.constant 1.000000e+00 : f32
    %147 = vector.broadcast %cst_84 : f32 to vector<16x128xf32>
    %148 = arith.subf %147, %142 : vector<16x128xf32>
    %cst_85 = arith.constant 5.000000e-01 : f32
    %149 = vector.broadcast %cst_85 : f32 to vector<16x128xf32>
    %150 = arith.mulf %148, %149 : vector<16x128xf32>
    %151 = arith.mulf %150, %131 : vector<16x128xf32>
    %c6_86 = arith.constant 6 : index
    %c0_87 = arith.constant 0 : index
    %c0_88 = arith.constant 0 : index
    %152 = vector.load %arg2[%c6_86, %c0_87, %c0_88] : memref<8x16x128xf32, #tpu.memory_space<vmem>>, vector<1x16x128xf32>
    %153 = vector.shape_cast %152 : vector<1x16x128xf32> to vector<16x128xf32>
    %154 = arith.addf %151, %153 : vector<16x128xf32>
    %cst_89 = arith.constant 1.000000e+00 : f32
    %155 = vector.broadcast %cst_89 : f32 to vector<16x128xf32>
    %156 = arith.subf %154, %155 : vector<16x128xf32>
    %cst_90 = arith.constant 0.000000e+00 : f32
    %157 = vector.broadcast %cst_90 : f32 to vector<16x128xf32>
    %158 = arith.cmpf ogt, %156, %157 : vector<16x128xf32>
    %cst_91 = arith.constant 0.000000e+00 : f32
    %159 = vector.broadcast %cst_91 : f32 to vector<16x128xf32>
    %160 = arith.cmpf olt, %156, %159 : vector<16x128xf32>
    %cst_92 = arith.constant 0.000000e+00 : f32
    %cst_93 = arith.constant 5.000000e-01 : f32
    %161 = vector.broadcast %cst_92 : f32 to vector<16x128xf32>
    %162 = vector.broadcast %cst_93 : f32 to vector<16x128xf32>
    %163 = arith.select %160, %161, %162 : vector<16x128xi1>, vector<16x128xf32>
    %cst_94 = arith.constant 1.000000e+00 : f32
    %164 = vector.broadcast %cst_94 : f32 to vector<16x128xf32>
    %165 = arith.select %158, %164, %163 : vector<16x128xi1>, vector<16x128xf32>
    %166 = arith.truncf %165 : vector<16x128xf32> to vector<16x128xbf16>
    %c7 = arith.constant 7 : index
    %c0_95 = arith.constant 0 : index
    %c0_96 = arith.constant 0 : index
    %167 = vector.load %arg5[%c7, %c0_95, %c0_96] : memref<8x16x128xbf16, #tpu.memory_space<vmem>>, vector<1x16x128xbf16>
    %168 = vector.shape_cast %167 : vector<1x16x128xbf16> to vector<16x128xbf16>
    %169 = vector.shape_cast %166 : vector<16x128xbf16> to vector<1x16x128xbf16>
    tpu.vector_store %arg5[%c7, %c0_95, %c0_96], %169 {strides = array<i32>} : memref<8x16x128xbf16, #tpu.memory_space<vmem>>, vector<1x16x128xbf16>,
    %cst_97 = arith.constant 1.000000e+00 : f32
    %170 = vector.broadcast %cst_97 : f32 to vector<16x128xf32>
    %171 = arith.subf %170, %165 : vector<16x128xf32>
    %cst_98 = arith.constant 5.000000e-01 : f32
    %172 = vector.broadcast %cst_98 : f32 to vector<16x128xf32>
    %173 = arith.mulf %171, %172 : vector<16x128xf32>
    %174 = arith.mulf %173, %154 : vector<16x128xf32>
    %c7_99 = arith.constant 7 : index
    %c0_100 = arith.constant 0 : index
    %c0_101 = arith.constant 0 : index
    %175 = vector.load %arg2[%c7_99, %c0_100, %c0_101] : memref<8x16x128xf32, #tpu.memory_space<vmem>>, vector<1x16x128xf32>
    %176 = vector.shape_cast %175 : vector<1x16x128xf32> to vector<16x128xf32>
    %177 = arith.addf %174, %176 : vector<16x128xf32>
    %cst_102 = arith.constant 1.000000e+00 : f32
    %178 = vector.broadcast %cst_102 : f32 to vector<16x128xf32>
    %179 = arith.subf %177, %178 : vector<16x128xf32>
    %cst_103 = arith.constant 0.000000e+00 : f32
    %180 = vector.broadcast %cst_103 : f32 to vector<16x128xf32>
    %181 = arith.cmpf ogt, %179, %180 : vector<16x128xf32>
    %cst_104 = arith.constant 0.000000e+00 : f32
    %182 = vector.broadcast %cst_104 : f32 to vector<16x128xf32>
    %183 = arith.cmpf olt, %179, %182 : vector<16x128xf32>
    %cst_105 = arith.constant 0.000000e+00 : f32
    %cst_106 = arith.constant 5.000000e-01 : f32
    %184 = vector.broadcast %cst_105 : f32 to vector<16x128xf32>
    %185 = vector.broadcast %cst_106 : f32 to vector<16x128xf32>
    %186 = arith.select %183, %184, %185 : vector<16x128xi1>, vector<16x128xf32>
    %cst_107 = arith.constant 1.000000e+00 : f32
    %187 = vector.broadcast %cst_107 : f32 to vector<16x128xf32>
    %188 = arith.select %181, %187, %186 : vector<16x128xi1>, vector<16x128xf32>
    %c0_108 = arith.constant 0 : index
    %c0_109 = arith.constant 0 : index
    %189 = vector.load %arg6[%c0_108, %c0_109] : memref<16x128xf32, #tpu.memory_space<vmem>>, vector<16x128xf32>
    tpu.vector_store %arg6[%c0_108, %c0_109], %177 {strides = array<i32>} : memref<16x128xf32, #tpu.memory_space<vmem>>, vector<16x128xf32>,
    %c0_110 = arith.constant 0 : index
    %c0_111 = arith.constant 0 : index
    %190 = vector.load %arg7[%c0_110, %c0_111] : memref<16x128xf32, #tpu.memory_space<vmem>>, vector<16x128xf32>
    tpu.vector_store %arg7[%c0_110, %c0_111], %188 {strides = array<i32>} : memref<16x128xf32, #tpu.memory_space<vmem>>, vector<16x128xf32>,
    return
  }
  func.func @transform_0(%arg0: i32, %arg1: i32) -> (i32, i32, i32) {
    %c0_i32 = arith.constant 0 : i32
    %c0_i32_0 = arith.constant 0 : i32
    return %arg1, %arg0, %c0_i32 : i32, i32, i32
  }
  func.func @transform_1(%arg0: i32, %arg1: i32) -> (i32, i32) {
    %c0_i32 = arith.constant 0 : i32
    %c0_i32_0 = arith.constant 0 : i32
    return %arg0, %c0_i32 : i32, i32
  }
  func.func @transform_2(%arg0: i32, %arg1: i32) -> (i32, i32) {
    %c0_i32 = arith.constant 0 : i32
    %c0_i32_0 = arith.constant 0 : i32
    return %arg0, %c0_i32 : i32, i32
  }
  func.func @transform_3(%arg0: i32, %arg1: i32) -> (i32, i32, i32) {
    %c0_i32 = arith.constant 0 : i32
    %c0_i32_0 = arith.constant 0 : i32
    return %arg1, %arg0, %c0_i32 : i32, i32, i32
  }
  func.func @transform_4(%arg0: i32, %arg1: i32) -> (i32, i32) {
    %c0_i32 = arith.constant 0 : i32
    %c0_i32_0 = arith.constant 0 : i32
    return %arg0, %c0_i32 : i32, i32
  }
}

</mosaic_0001>

<bundles_post_ra>
// kernel: spiking_decay_forward.1
= control target key start
LH: loop header
LB: loop body
LE: loop exit
PB: predicated region body
PF: predicated region fallthrough
CT: control target
= control target key end

     0   :  { %v408_v17 = vmov 0.5   ;;  %s538_s1 = inlined_call_operand.vmem [shape: f32[16,128], index: 1, kind: input, shape index: {}, may-alias: {1,4}]   ;;  %s539_s2 = inlined_call_operand.vmem [shape: f32[16,128], index: 2, kind: input, shape index: {}]   ;;  %s540_s0 = inlined_call_operand.vmem [shape: f32[8,16,128], index: 0, kind: input, shape index: {}]   ;;  %s541_s3 = inlined_call_operand.vmem [shape: bf16[8,16,128], index: 3, kind: output, shape index: {0}]   ;;  %s542_s4 = inlined_call_operand.vmem [shape: f32[16,128], index: 4, kind: output, shape index: {1}, may-alias: {1,4}]  }
   0x1   :  { %v24_v0 = vld [vmem:[%s539_s2] sm:$0xff]  ;;  %v25_v1 = vld [vmem:[%s539_s2 + $0x8] sm:$0xff]  ;;  %v306_v27 = vld [vmem:[%s540_s0 + $0x10] sm:$0xff] }
   0x2   :  { %v42_v2 = vsub.f32 1.0, %v24_v0  ;;  %v20_v3 = vld [vmem:[%s538_s1] sm:$0xff]  ;;  %v43_v4 = vsub.f32 1.0, %v25_v1  ;;  %v377_v5 = vpack.c.bf16 %v25_v1, %v24_v0  ;;  %v21_v6 = vld [vmem:[%s538_s1 + $0x8] sm:$0xff]  ;;  %v307_v29 = vld [vmem:[%s540_s0 + $0x18] sm:$0xff] }
   0x3   :  { %v48_v9 = vld [vmem:[%s540_s0] sm:$0xff]  ;;  %v49_v11 = vld [vmem:[%s540_s0 + $0x8] sm:$0xff]  ;;  %v322_v61 = vld [vmem:[%s540_s0 + $0x30] sm:$0xff] }
   0x4   :  { %v44_v7 = vmul.f32 0.5, %v42_v2  ;;  %v45_v8 = vmul.f32 0.5, %v43_v4  ;;  %378 = vst [vmem:[%s541_s3] sm:$0xff] %v377_v5   ;;  %v314_v44 = vld [vmem:[%s540_s0 + $0x20] sm:$0xff]  ;;  %v315_v46 = vld [vmem:[%s540_s0 + $0x28] sm:$0xff]  ;;  %v323_v63 = vld [vmem:[%s540_s0 + $0x38] sm:$0xff] }
   0x6   :  { %v46_v10 = vmul.f32 %v44_v7, %v20_v3  ;;  %v47_v12 = vmul.f32 %v45_v8, %v21_v6 }
   0x8   :  { %v50_v13 = vadd.f32 %v48_v9, %v46_v10  ;;  %v51_v14 = vadd.f32 %v49_v11, %v47_v12 }
   0xa   :  { %v300_v15 = vadd.f32 -1.0, %v50_v13  ;;  %v301_v16 = vadd.f32 -1.0, %v51_v14 }
   0xc   :  { %vm54_vm0 = vcmp.gt.f32.partialorder %v300_v15, 0.0  ;;  %vm56_vm1 = vcmp.lt.f32.partialorder %v300_v15, 0.0  ;;  %vm55_vm2 = vcmp.gt.f32.partialorder %v301_v16, 0.0  ;;  %vm57_vm3 = vcmp.lt.f32.partialorder %v301_v16, 0.0  ;;  %v331_v16 = vld [vmem:[%s540_s0 + $0x48] sm:$0xff] }
   0xd   :  { %v58_v18 = vsel %vm56_vm1, 0.0, %v408_v17  ;;  %v59_v19 = vsel %vm57_vm3, 0.0, %v408_v17 }
   0xe   :  { %v60_v20 = vsel %vm54_vm0, 1.0, %v58_v18  ;;  %v61_v21 = vsel %vm55_vm2, 1.0, %v59_v19 }
   0xf   :  { %v73_v22 = vsub.f32 1.0, %v60_v20  ;;  %v380_v23 = vpack.c.bf16 %v61_v21, %v60_v20  ;;  %v74_v24 = vsub.f32 1.0, %v61_v21 }
  0x11   :  { %v75_v25 = vmul.f32 0.5, %v73_v22  ;;  %400 = vst [vmem:[%s541_s3 + $0x8] sm:$0xff] %v380_v23   ;;  %v76_v26 = vmul.f32 0.5, %v74_v24 }
  0x13   :  { %v77_v28 = vmul.f32 %v75_v25, %v50_v13  ;;  %v78_v30 = vmul.f32 %v76_v26, %v51_v14  ;;  %v330_v14 = vld [vmem:[%s540_s0 + $0x40] sm:$0xff] }
  0x15   :  { %v82_v31 = vadd.f32 %v306_v27, %v77_v28  ;;  %v83_v32 = vadd.f32 %v307_v29, %v78_v30 }
  0x17   :  { %v308_v33 = vadd.f32 -1.0, %v82_v31  ;;  %v309_v34 = vadd.f32 -1.0, %v83_v32 }
  0x19   :  { %vm86_vm4 = vcmp.gt.f32.partialorder %v308_v33, 0.0  ;;  %vm88_vm5 = vcmp.lt.f32.partialorder %v308_v33, 0.0  ;;  %vm87_vm6 = vcmp.gt.f32.partialorder %v309_v34, 0.0  ;;  %vm89_vm7 = vcmp.lt.f32.partialorder %v309_v34, 0.0  ;;  %v339_v34 = vld [vmem:[%s540_s0 + $0x58] sm:$0xff] }
  0x1a   :  { %v90_v35 = vsel %vm88_vm5, 0.0, %v408_v17  ;;  %v91_v36 = vsel %vm89_vm7, 0.0, %v408_v17 }
  0x1b   :  { %v92_v37 = vsel %vm86_vm4, 1.0, %v90_v35  ;;  %v93_v38 = vsel %vm87_vm6, 1.0, %v91_v36 }
  0x1c   :  { %v105_v39 = vsub.f32 1.0, %v92_v37  ;;  %v383_v40 = vpack.c.bf16 %v93_v38, %v92_v37  ;;  %v106_v41 = vsub.f32 1.0, %v93_v38 }
  0x1e   :  { %v107_v42 = vmul.f32 0.5, %v105_v39  ;;  %401 = vst [vmem:[%s541_s3 + $0x10] sm:$0xff] %v383_v40   ;;  %v108_v43 = vmul.f32 0.5, %v106_v41 }
  0x20   :  { %v109_v45 = vmul.f32 %v107_v42, %v82_v31  ;;  %v110_v47 = vmul.f32 %v108_v43, %v83_v32  ;;  %v338_v32 = vld [vmem:[%s540_s0 + $0x50] sm:$0xff] }
  0x22   :  { %v114_v48 = vadd.f32 %v314_v44, %v109_v45  ;;  %v115_v49 = vadd.f32 %v315_v46, %v110_v47 }
  0x24   :  { %v316_v50 = vadd.f32 -1.0, %v114_v48  ;;  %v317_v51 = vadd.f32 -1.0, %v115_v49 }
  0x26   :  { %vm118_vm8 = vcmp.gt.f32.partialorder %v316_v50, 0.0  ;;  %vm120_vm9 = vcmp.lt.f32.partialorder %v316_v50, 0.0  ;;  %vm119_vm10 = vcmp.gt.f32.partialorder %v317_v51, 0.0  ;;  %vm121_vm11 = vcmp.lt.f32.partialorder %v317_v51, 0.0  ;;  %v347_v51 = vld [vmem:[%s540_s0 + $0x68] sm:$0xff] }
  0x27   :  { %v122_v52 = vsel %vm120_vm9, 0.0, %v408_v17  ;;  %v123_v53 = vsel %vm121_vm11, 0.0, %v408_v17 }
  0x28   :  { %v124_v54 = vsel %vm118_vm8, 1.0, %v122_v52  ;;  %v125_v55 = vsel %vm119_vm10, 1.0, %v123_v53 }
  0x29   :  { %v137_v56 = vsub.f32 1.0, %v124_v54  ;;  %v386_v57 = vpack.c.bf16 %v125_v55, %v124_v54  ;;  %v138_v58 = vsub.f32 1.0, %v125_v55 }
  0x2b   :  { %v139_v59 = vmul.f32 0.5, %v137_v56  ;;  %402 = vst [vmem:[%s541_s3 + $0x18] sm:$0xff] %v386_v57   ;;  %v140_v60 = vmul.f32 0.5, %v138_v58 }
  0x2d   :  { %v141_v62 = vmul.f32 %v139_v59, %v114_v48  ;;  %v142_v0 = vmul.f32 %v140_v60, %v115_v49  ;;  %v346_v49 = vld [vmem:[%s540_s0 + $0x60] sm:$0xff] }
  0x2f   :  { %v146_v1 = vadd.f32 %v322_v61, %v141_v62  ;;  %v147_v2 = vadd.f32 %v323_v63, %v142_v0 }
  0x31   :  { %v324_v3 = vadd.f32 -1.0, %v146_v1  ;;  %v325_v4 = vadd.f32 -1.0, %v147_v2 }
  0x33   :  { %vm150_vm12 = vcmp.gt.f32.partialorder %v324_v3, 0.0  ;;  %vm152_vm13 = vcmp.lt.f32.partialorder %v324_v3, 0.0  ;;  %vm151_vm14 = vcmp.gt.f32.partialorder %v325_v4, 0.0  ;;  %vm153_vm15 = vcmp.lt.f32.partialorder %v325_v4, 0.0 }
  0x34   :  { %v154_v5 = vsel %vm152_vm13, 0.0, %v408_v17  ;;  %v155_v6 = vsel %vm153_vm15, 0.0, %v408_v17 }
  0x35   :  { %v156_v7 = vsel %vm150_vm12, 1.0, %v154_v5  ;;  %v157_v8 = vsel %vm151_vm14, 1.0, %v155_v6 }
  0x36   :  { %v169_v9 = vsub.f32 1.0, %v156_v7  ;;  %v389_v10 = vpack.c.bf16 %v157_v8, %v156_v7  ;;  %v170_v11 = vsub.f32 1.0, %v157_v8 }
  0x38   :  { %v171_v12 = vmul.f32 0.5, %v169_v9  ;;  %403 = vst [vmem:[%s541_s3 + $0x20] sm:$0xff] %v389_v10   ;;  %v172_v13 = vmul.f32 0.5, %v170_v11 }
  0x3a   :  { %v173_v15 = vmul.f32 %v171_v12, %v146_v1  ;;  %v174_v18 = vmul.f32 %v172_v13, %v147_v2  ;;  %v354_v2 = vld [vmem:[%s540_s0 + $0x70] sm:$0xff] }
  0x3c   :  { %v178_v19 = vadd.f32 %v330_v14, %v173_v15  ;;  %v179_v20 = vadd.f32 %v331_v16, %v174_v18 }
  0x3e   :  { %v332_v21 = vadd.f32 -1.0, %v178_v19  ;;  %v333_v22 = vadd.f32 -1.0, %v179_v20 }
  0x40   :  { %vm182_vm0 = vcmp.gt.f32.partialorder %v332_v21, 0.0  ;;  %vm184_vm1 = vcmp.lt.f32.partialorder %v332_v21, 0.0  ;;  %vm183_vm2 = vcmp.gt.f32.partialorder %v333_v22, 0.0  ;;  %vm185_vm3 = vcmp.lt.f32.partialorder %v333_v22, 0.0 }
  0x41   :  { %v186_v23 = vsel %vm184_vm1, 0.0, %v408_v17  ;;  %v187_v24 = vsel %vm185_vm3, 0.0, %v408_v17 }
  0x42   :  { %v188_v25 = vsel %vm182_vm0, 1.0, %v186_v23  ;;  %v189_v26 = vsel %vm183_vm2, 1.0, %v187_v24 }
  0x43   :  { %v201_v27 = vsub.f32 1.0, %v188_v25  ;;  %v392_v28 = vpack.c.bf16 %v189_v26, %v188_v25  ;;  %v202_v29 = vsub.f32 1.0, %v189_v26 }
  0x45   :  { %v203_v30 = vmul.f32 0.5, %v201_v27  ;;  %404 = vst [vmem:[%s541_s3 + $0x28] sm:$0xff] %v392_v28   ;;  %v204_v31 = vmul.f32 0.5, %v202_v29 }
  0x47   :  { %v205_v33 = vmul.f32 %v203_v30, %v178_v19  ;;  %v206_v35 = vmul.f32 %v204_v31, %v179_v20 }
  0x49   :  { %v210_v36 = vadd.f32 %v338_v32, %v205_v33  ;;  %v211_v37 = vadd.f32 %v339_v34, %v206_v35 }
  0x4b   :  { %v340_v38 = vadd.f32 -1.0, %v210_v36  ;;  %v341_v39 = vadd.f32 -1.0, %v211_v37 }
  0x4d   :  { %vm214_vm4 = vcmp.gt.f32.partialorder %v340_v38, 0.0  ;;  %vm216_vm5 = vcmp.lt.f32.partialorder %v340_v38, 0.0  ;;  %vm215_vm6 = vcmp.gt.f32.partialorder %v341_v39, 0.0  ;;  %vm217_vm7 = vcmp.lt.f32.partialorder %v341_v39, 0.0 }
  0x4e   :  { %v218_v40 = vsel %vm216_vm5, 0.0, %v408_v17  ;;  %v219_v41 = vsel %vm217_vm7, 0.0, %v408_v17 }
  0x4f   :  { %v220_v42 = vsel %vm214_vm4, 1.0, %v218_v40  ;;  %v221_v43 = vsel %vm215_vm6, 1.0, %v219_v41 }
  0x50   :  { %v233_v44 = vsub.f32 1.0, %v220_v42  ;;  %v395_v45 = vpack.c.bf16 %v221_v43, %v220_v42  ;;  %v234_v46 = vsub.f32 1.0, %v221_v43 }
  0x52   :  { %v235_v47 = vmul.f32 0.5, %v233_v44  ;;  %405 = vst [vmem:[%s541_s3 + $0x30] sm:$0xff] %v395_v45   ;;  %v236_v48 = vmul.f32 0.5, %v234_v46 }
  0x54   :  { %v237_v50 = vmul.f32 %v235_v47, %v210_v36  ;;  %v238_v52 = vmul.f32 %v236_v48, %v211_v37 }
  0x56   :  { %v242_v53 = vadd.f32 %v346_v49, %v237_v50  ;;  %v243_v54 = vadd.f32 %v347_v51, %v238_v52 }
  0x58   :  { %v348_v55 = vadd.f32 -1.0, %v242_v53  ;;  %v349_v56 = vadd.f32 -1.0, %v243_v54 }
  0x5a   :  { %vm246_vm8 = vcmp.gt.f32.partialorder %v348_v55, 0.0  ;;  %vm248_vm9 = vcmp.lt.f32.partialorder %v348_v55, 0.0  ;;  %vm247_vm10 = vcmp.gt.f32.partialorder %v349_v56, 0.0  ;;  %vm249_vm11 = vcmp.lt.f32.partialorder %v349_v56, 0.0 }
  0x5b   :  { %v250_v57 = vsel %vm248_vm9, 0.0, %v408_v17  ;;  %v251_v58 = vsel %vm249_vm11, 0.0, %v408_v17  ;;  %v355_v17 = vld [vmem:[%s540_s0 + $0x78] sm:$0xff] }
  0x5c   :  { %v252_v59 = vsel %vm246_vm8, 1.0, %v250_v57  ;;  %v253_v60 = vsel %vm247_vm10, 1.0, %v251_v58 }
  0x5d   :  { %v265_v61 = vsub.f32 1.0, %v252_v59  ;;  %v398_v62 = vpack.c.bf16 %v253_v60, %v252_v59  ;;  %v266_v63 = vsub.f32 1.0, %v253_v60 }
  0x5f   :  { %v267_v0 = vmul.f32 0.5, %v265_v61  ;;  %406 = vst [vmem:[%s541_s3 + $0x38] sm:$0xff] %v398_v62   ;;  %v268_v1 = vmul.f32 0.5, %v266_v63 }
  0x61   :  { %v269_v3 = vmul.f32 %v267_v0, %v242_v53  ;;  %v270_v4 = vmul.f32 %v268_v1, %v243_v54 }
  0x63   :  { %v274_v5 = vadd.f32 %v354_v2, %v269_v3  ;;  %v275_v6 = vadd.f32 %v355_v17, %v270_v4 }
  0x65   :  { %286 = vst [vmem:[%s542_s4] sm:$0xff] %v274_v5  ;;  %287 = vst [vmem:[%s542_s4 + $0x8] sm:$0xff] %v275_v6 }

</bundles_post_ra>
